<compile_context>
chip_gen: v5e
topology: v5e:2x2
jax: 0.10.0
libtpu: 0.0.40
codegen_flags: <defaults>
</compile_context>

<pallas_src>
import math

import jax
import jax.numpy as jnp
from jax import lax
from jax.experimental import pallas as pl
from jax.experimental.pallas import tpu as pltpu


_LANE = 128
_SUBLANE = 8
_EPS2 = 1e-24                      # (1e-12)**2 — matches F.normalize's clamp
_MAX_SINGLE_K = 4096               # collapse the k axis when D_pad fits one tile
_TN_TARGET = 512                   # lane-dense output tile (4 x 128)
_VMEM_TILE_BUDGET = 36 * 1024 * 1024   # double-buffered tile budget (v7x-safe)
_VMEM_LIMIT_BYTES = 48 * 1024 * 1024   # scoped VMEM limit passed to Mosaic


def _round_up(a, b):
    return (a + b - 1) // b * b


# ---------------------------------------------------------------------------
# Kernels
# ---------------------------------------------------------------------------

def _cosine_kernel_single_k(x_ref, w_ref, invx_ref, invw_ref, o_ref):
    """grid = (i, j): full contraction in one step, no accumulator control flow."""
    acc = lax.dot_general(
        x_ref[...], w_ref[...],
        dimension_numbers=(((1,), (1,)), ((), ())),   # contract dim 1 of both
        preferred_element_type=jnp.float32,
    )
    # L2 normalization applied as a post-scale of the matmul result.
    o_ref[...] = acc * invx_ref[...] * invw_ref[...]


def _cosine_kernel_multi_k(x_ref, w_ref, invx_ref, invw_ref, o_ref):
    """grid = (i, j, k): accumulate directly into the f32, VMEM-resident o_ref."""
    k = pl.program_id(2)

    @pl.when(k == 0)
    def _init():
        o_ref[...] = jnp.zeros_like(o_ref)

    o_ref[...] += lax.dot_general(
        x_ref[...], w_ref[...],
        dimension_numbers=(((1,), (1,)), ((), ())),
        preferred_element_type=jnp.float32,
    )

    @pl.when(k == pl.num_programs(2) - 1)
    def _finalize():
        o_ref[...] = o_ref[...] * invx_ref[...] * invw_ref[...]


# ---------------------------------------------------------------------------
# Tiling plan
# ---------------------------------------------------------------------------

def _plan_k(D):
    """Contraction tile: take the whole (padded) D when it fits a single tile."""
    tk_full = _round_up(D, _LANE)
    tk = tk_full if tk_full <= _MAX_SINGLE_K else 2048
    return tk, _round_up(D, tk)


def _plan_m(B, tk, tn_target=_TN_TARGET):
    """Grow tm toward the whole batch (weight streamed once) within VMEM budget."""
    tm = _round_up(B, _SUBLANE)

    def footprint(tm_):
        x_buf = 2 * tm_ * tk * 2            # bf16, double-buffered
        w_buf = 2 * tn_target * tk * 2      # bf16, double-buffered
        o_buf = 2 * tm_ * tn_target * 4     # f32, double-buffered
        return x_buf + w_buf + o_buf

    while footprint(tm) > _VMEM_TILE_BUDGET and tm > 256:
        tm = max(256, _round_up(tm // 2, _SUBLANE))
    return tm, _round_up(B, tm)


# ---------------------------------------------------------------------------
# Data prep (weight prep is one-time / cached; x prep is once per forward)
# ---------------------------------------------------------------------------

def _inv_l2_norm(v):
    v32 = v.astype(jnp.float32)
    sq = jnp.sum(v32 * v32, axis=1, keepdims=True)
    return lax.rsqrt(jnp.maximum(sq, jnp.float32(_EPS2)))


def prepare_weight(w, D_pad, tn_target=_TN_TARGET):
    """One-time weight prep: f32 master inverse norms + padded bf16 weight."""
    O, D = w.shape
    tn = min(tn_target, _round_up(O, _LANE))
    O_pad = _round_up(O, tn)
    inv_w = _inv_l2_norm(w).reshape(1, O)                 # f32 master copy
    w_p = jnp.pad(w.astype(jnp.bfloat16), ((0, O_pad - O), (0, D_pad - D)))
    inv_w_p = jnp.pad(inv_w, ((0, 0), (0, O_pad - O)))    # padded cols -> 0 output
    return {"w": w_p, "inv_w": inv_w_p, "tn": tn, "O": O, "O_pad": O_pad}


def prepare_split_cosine_params(w1, w2, sigma, tn_target=_TN_TARGET):
    """Cache padded bf16 weights and f32 inverse norms across forward calls."""
    D = w1.shape[1]
    assert w2.shape[1] == D
    tk, D_pad = _plan_k(D)
    return {
        "tk": tk,
        "D_pad": D_pad,
        "sigma": sigma,
        "fc1": prepare_weight(w1, D_pad, tn_target),
        "fc2": prepare_weight(w2, D_pad, tn_target),
    }


def _prepare_input(x, B_pad, D_pad):
    B, D = x.shape
    inv_x = _inv_l2_norm(x)                               # (B, 1), f32, rsqrt (EUP)
    x_p = jnp.pad(x.astype(jnp.bfloat16), ((0, B_pad - B), (0, D_pad - D)))
    inv_x_p = jnp.pad(inv_x, ((0, B_pad - B), (0, 0)))    # padded rows -> 0 output
    return x_p, inv_x_p


# ---------------------------------------------------------------------------
# pallas_call wrapper
# ---------------------------------------------------------------------------

def _cosine_linear_call(x_p, inv_x_p, wpack, tm, tk):
    B_pad, D_pad = x_p.shape
    w_p, inv_w_p = wpack["w"], wpack["inv_w"]
    tn, O_pad = wpack["tn"], wpack["O_pad"]
    nk = D_pad // tk

    cost = pl.CostEstimate(
        flops=2 * B_pad * O_pad * D_pad,
        transcendentals=0,
        bytes_accessed=(x_p.size * 2 + w_p.size * 2 + B_pad * O_pad * 4
                        + inv_x_p.size * 4 + inv_w_p.size * 4),
    )

    if nk == 1:
        grid = (B_pad // tm, O_pad // tn)
        kernel = _cosine_kernel_single_k
        in_specs = [
            pl.BlockSpec((tm, tk), lambda i, j: (i, 0)),   # x tile (i-invariant in j)
            pl.BlockSpec((tn, tk), lambda i, j: (j, 0)),   # w tile (streamed once)
            pl.BlockSpec((tm, 1), lambda i, j: (i, 0)),    # 1/||x||
            pl.BlockSpec((1, tn), lambda i, j: (0, j)),    # 1/||w||
        ]
        out_spec = pl.BlockSpec((tm, tn), lambda i, j: (i, j))
        semantics = ("parallel", "parallel")
    else:
        grid = (B_pad // tm, O_pad // tn, nk)              # reduction axis last
        kernel = _cosine_kernel_multi_k
        in_specs = [
            pl.BlockSpec((tm, tk), lambda i, j, k: (i, k)),
            pl.BlockSpec((tn, tk), lambda i, j, k: (j, k)),
            pl.BlockSpec((tm, 1), lambda i, j, k: (i, 0)),
            pl.BlockSpec((1, tn), lambda i, j, k: (0, j)),
        ]
        out_spec = pl.BlockSpec((tm, tn), lambda i, j, k: (i, j))
        semantics = ("parallel", "parallel", "arbitrary")

    out = pl.pallas_call(
        kernel,
        out_shape=jax.ShapeDtypeStruct((B_pad, O_pad), jnp.float32),
        grid_spec=pltpu.PrefetchScalarGridSpec(
            num_scalar_prefetch=0,
            grid=grid,
            in_specs=in_specs,
            out_specs=out_spec,
        ),
        compiler_params=pltpu.CompilerParams(
            dimension_semantics=semantics,
            vmem_limit_bytes=_VMEM_LIMIT_BYTES,
        ),
        cost_estimate=cost,
    )(x_p, w_p, inv_x_p, inv_w_p)
    return out


# ---------------------------------------------------------------------------
# Module forward (matches the PyTorch SplitCosineLinear semantics)
# ---------------------------------------------------------------------------

def reduce_proxies(out, nb_proxy):
    """Softmax-attention pooling over the proxy axis (matches the PyTorch ref)."""
    if nb_proxy == 1:
        return out
    bs, total = out.shape
    assert total % nb_proxy == 0, "Shape error"
    nb_classes = total // nb_proxy
    simi_per_class = out.reshape(bs, nb_classes, nb_proxy)
    attentions = jax.nn.softmax(simi_per_class, axis=-1)
    return jnp.sum(attentions * simi_per_class, axis=-1)


def split_cosine_linear_forward(x, params, nb_proxy):
    """Forward pass of SplitCosineLinear given cached (prepared) weights."""
    tk, D_pad = params["tk"], params["D_pad"]
    B, _ = x.shape
    tm, B_pad = _plan_m(B, tk)

    # x-side prep done ONCE and shared by the fc1/fc2 launches.
    x_p, inv_x_p = _prepare_input(x, B_pad, D_pad)

    fc1, fc2 = params["fc1"], params["fc2"]
    out1 = _cosine_linear_call(x_p, inv_x_p, fc1, tm, tk)[:B, :fc1["O"]]
    out2 = _cosine_linear_call(x_p, inv_x_p, fc2, tm, tk)[:B, :fc2["O"]]
    out_cat = jnp.concatenate([out1, out2], axis=1)

    logits = reduce_proxies(out_cat, nb_proxy)
    sigma = params["sigma"]
    if sigma is not None:
        logits = sigma * logits

    return {
        "old_scores": reduce_proxies(out1, nb_proxy),
        "new_scores": reduce_proxies(out2, nb_proxy),
        "logits": logits,
    }


def init_params(key, in_features, out_features1, out_features2, nb_proxy):
    """Deterministic parameter init matching CosineLinear.reset_parameters."""
    k1, k2 = jax.random.split(key)
    stdv = 1.0 / math.sqrt(in_features)
    w1 = jax.random.uniform(
        k1, (out_features1 * nb_proxy, in_features),
        minval=-stdv, maxval=stdv, dtype=jnp.float32)
    w2 = jax.random.uniform(
        k2, (out_features2 * nb_proxy, in_features),
        minval=-stdv, maxval=stdv, dtype=jnp.float32)
    sigma = jnp.float32(1.0)  # SplitCosineLinear fills sigma with 1
    return w1, w2, sigma


if __name__ == "__main__":
    # Small, module-consistent shapes.
    B = 8
    in_features = 32
    out_features1 = 4
    out_features2 = 6
    nb_proxy = 2

    key = jax.random.PRNGKey(0)
    kx, kp = jax.random.split(key)
    x = jax.random.normal(kx, (B, in_features), dtype=jnp.float32)
    w1, w2, sigma = init_params(kp, in_features, out_features1, out_features2, nb_proxy)

    # One-time weight prep (cached across forward calls).
    params = prepare_split_cosine_params(w1, w2, sigma)

    out = split_cosine_linear_forward(x, params, nb_proxy)
    out = jax.block_until_ready(out)

    # Reference in plain JAX (f32 everywhere, no Pallas).
    def _norm(v):
        n = jnp.sqrt(jnp.sum(v * v, axis=1, keepdims=True))
        return v / jnp.maximum(n, 1e-12)

    o1 = _norm(x) @ _norm(w1).T
    o2 = _norm(x) @ _norm(w2).T
    cat = jnp.concatenate([o1, o2], axis=1)
    ref = {
        "old_scores": reduce_proxies(o1, nb_proxy),
        "new_scores": reduce_proxies(o2, nb_proxy),
        "logits": sigma * reduce_proxies(cat, nb_proxy),
    }

    for name in ("old_scores", "new_scores", "logits"):
        assert out[name].shape == ref[name].shape, name
        # bf16 MXU operands vs f32 reference -> loosened tolerance.
        assert jnp.allclose(out[name], ref[name], atol=2e-2, rtol=2e-2), name

    print("KERNEL_OK")
</pallas_src>

<mosaic_0001>
module attributes {stable_mosaic.version = 11 : i64} {
  func.func @_cosine_kernel_single_k(%arg0: i32, %arg1: i32, %arg2: memref<8x128xbf16, #tpu.memory_space<vmem>>, %arg3: memref<128x128xbf16, #tpu.memory_space<vmem>>, %arg4: memref<8x1xf32, #tpu.memory_space<vmem>>, %arg5: memref<1x128xf32, #tpu.memory_space<vmem>>, %arg6: memref<8x128xf32, #tpu.memory_space<vmem>>) attributes {dimension_semantics = [#tpu.dimension_semantics<parallel>, #tpu.dimension_semantics<parallel>], iteration_bounds = array<i64: 1, 1>, scalar_prefetch = 0 : i64, scratch_operands = 0 : i64, tpu.core_type = #tpu.core_type<tc>, window_params = [{transform_indices = @transform_0, window_bounds = array<i64: 8, 128>}, {transform_indices = @transform_1, window_bounds = array<i64: 128, 128>}, {transform_indices = @transform_2, window_bounds = array<i64: 8, 1>}, {transform_indices = @transform_3, window_bounds = array<i64: 1, 128>}, {transform_indices = @transform_4, window_bounds = array<i64: 8, 128>}]} {
    %c0 = arith.constant 0 : index
    %c0_0 = arith.constant 0 : index
    %0 = vector.load %arg2[%c0, %c0_0] : memref<8x128xbf16, #tpu.memory_space<vmem>>, vector<8x128xbf16>
    %c0_1 = arith.constant 0 : index
    %c0_2 = arith.constant 0 : index
    %1 = vector.load %arg3[%c0_1, %c0_2] : memref<128x128xbf16, #tpu.memory_space<vmem>>, vector<128x128xbf16>
    %cst = arith.constant dense<0.000000e+00> : vector<8x128xf32>
    %2 = tpu.matmul %0, %1, %cst {dimension_numbers = #tpu.dot_dimension_numbers<[1], [1], [0], [0], [0, 0, 1, 0], [], []>} : vector<8x128xbf16>, vector<128x128xbf16>, vector<8x128xf32> -> vector<8x128xf32>
    %c0_3 = arith.constant 0 : index
    %c0_4 = arith.constant 0 : index
    %3 = vector.load %arg4[%c0_3, %c0_4] : memref<8x1xf32, #tpu.memory_space<vmem>>, vector<8x1xf32>
    %4 = vector.broadcast %3 : vector<8x1xf32> to vector<8x128xf32>
    %5 = arith.mulf %2, %4 : vector<8x128xf32>
    %c0_5 = arith.constant 0 : index
    %c0_6 = arith.constant 0 : index
    %6 = vector.load %arg5[%c0_5, %c0_6] : memref<1x128xf32, #tpu.memory_space<vmem>>, vector<1x128xf32>
    %7 = vector.broadcast %6 : vector<1x128xf32> to vector<8x128xf32>
    %8 = arith.mulf %5, %7 : vector<8x128xf32>
    %c0_7 = arith.constant 0 : index
    %c0_8 = arith.constant 0 : index
    %9 = vector.load %arg6[%c0_7, %c0_8] : memref<8x128xf32, #tpu.memory_space<vmem>>, vector<8x128xf32>
    tpu.vector_store %arg6[%c0_7, %c0_8], %8 {strides = array<i32>} : memref<8x128xf32, #tpu.memory_space<vmem>>, vector<8x128xf32>,
    return
  }
  func.func @transform_0(%arg0: i32, %arg1: i32) -> (i32, i32) {
    %c0_i32 = arith.constant 0 : i32
    %c0_i32_0 = arith.constant 0 : i32
    return %arg0, %c0_i32 : i32, i32
  }
  func.func @transform_1(%arg0: i32, %arg1: i32) -> (i32, i32) {
    %c0_i32 = arith.constant 0 : i32
    %c0_i32_0 = arith.constant 0 : i32
    return %arg1, %c0_i32 : i32, i32
  }
  func.func @transform_2(%arg0: i32, %arg1: i32) -> (i32, i32) {
    %c0_i32 = arith.constant 0 : i32
    %c0_i32_0 = arith.constant 0 : i32
    return %arg0, %c0_i32 : i32, i32
  }
  func.func @transform_3(%arg0: i32, %arg1: i32) -> (i32, i32) {
    %c0_i32 = arith.constant 0 : i32
    %c0_i32_0 = arith.constant 0 : i32
    return %c0_i32, %arg1 : i32, i32
  }
  func.func @transform_4(%arg0: i32, %arg1: i32) -> (i32, i32) {
    %c0_i32 = arith.constant 0 : i32
    return %arg0, %arg1 : i32, i32
  }
}

</mosaic_0001>

<bundles_post_ra>
// kernel: tpu_custom_call.1
= control target key start
LH: loop header
LB: loop body
LE: loop exit
PB: predicated region body
PF: predicated region fallthrough
CT: control target
= control target key end

     0   :  { %9 = vsyncpa [#allocation3], 0  ;;  %s286_s0 = inlined_call_operand.vmem [shape: bf16[8,128], index: 0, kind: input, shape index: {}]   ;;  %s287_s1 = inlined_call_operand.hbm [shape: bf16[128,128], index: 1, kind: input, shape index: {}]   ;;  %s288_s2 = inlined_call_operand.vmem [shape: f32[8,1], index: 2, kind: input, shape index: {}]   ;;  %s289_s3 = inlined_call_operand.vmem [shape: f32[1,128], index: 3, kind: input, shape index: {}]   ;;  %s290_s4 = inlined_call_operand.hbm [shape: f32[8,128], index: 4, kind: output, shape index: {}]  }
   0x1   :  { %10 = vsyncpa [#allocation4], 0  ;;  %s17_s17 = sshll.u32 %s287_s1, 4  ;;  %s241_s18 = smov [#allocation2]   ;;  %s18_s17 = int_to_ptr.hbm [resolvable:$true] %s17_s17 }
   0x2   :  { %s19_s19 = sshll.u32 %s241_s18, 4  ;;  %s242_s20 = smov 64   ;;  %s20_s19 = int_to_ptr.vmem [resolvable:$true] %s19_s19 }
   0x3   :  { %s243_s21 = smov 4  }
   0x4   :  { %25 = dma.hbm_to_vmem [thread:$0]  %s18_s17, 1024, %s20_s19, [#allocation3], %s242_s20, %s242_s20, %s243_s21  }
   0x5   :  { %237 = dma.done.wait [#allocation3], 1024  }
   0x6   :  { %238 = vsyncadd [#allocation3], 4294966272  ;;  %v181_v0 = vld [vmem:[#allocation2 + $0x38] sm:$0xff]  ;;  %v180_v1 = vld [vmem:[#allocation2 + $0x30] sm:$0xff]  ;;  %v244_v6 = vmov 0   ;;  %s132_s30 = sshll.u32 %s290_s4, 4  ;;  %s133_s30 = int_to_ptr.hbm [resolvable:$true] %s132_s30 }
   0x7   :  { %99 = vmatpush.bf16.xpose.msra.mxu0 %v181_v0  ;;  %v179_v2 = vld [vmem:[#allocation2 + $0x28] sm:$0xff]  ;;  %v178_v3 = vld [vmem:[#allocation2 + $0x20] sm:$0xff]  ;;  %v177_v4 = vld [vmem:[#allocation2 + $0x18] sm:$0xff]  ;;  %187 = vset.pattern.permute.xlu0 %v244_v6 }
   0x8   :  { %v112_v5 = vld [vmem:[%s288_s2] sm:$0xff]  ;;  %v176_v7 = vld [vmem:[#allocation2 + $0x10] sm:$0xff]  ;;  %v175_v8 = vld [vmem:[#allocation2 + $0x8] sm:$0xff]  ;;  %s245_s2 = smov [#allocation5]  }
   0x9   :  { %115 = vperm.xlu0 %187, %v112_v5   ;;  %v174_v9 = vld [vmem:[#allocation2] sm:$0xff]  ;;  %s130_s27 = sshll.u32 %s245_s2, 4  ;;  %s131_s27 = int_to_ptr.vmem [resolvable:$true] %s130_s27 }
   0xa   :  { %v34_v10 = vld [vmem:[%s286_s0] sm:$0xf] }
   0xb   :  { %v188_v12 = vld [vmem:[%s289_s3] ss:$0 sm:$0xff] }
   0xf   :  { %100 = vmatpush.bf16.xpose.msra.mxu0 %v180_v1 }
  0x17   :  { %101 = vmatpush.bf16.xpose.msra.mxu0 %v179_v2 }
  0x1f   :  { %102 = vmatpush.bf16.xpose.msra.mxu0 %v178_v3 }
  0x27   :  { %103 = vmatpush.bf16.xpose.msra.mxu0 %v177_v4 }
  0x2f   :  { %104 = vmatpush.bf16.xpose.msra.mxu0 %v176_v7 }
  0x37   :  { %105 = vmatpush.bf16.xpose.msra.mxu0 %v175_v8 }
  0x3f   :  { %106 = vmatpush.bf16.xpose.msra.mxu0 %v174_v9 }
  0x46   :  { %107 = vmatmul.bf16.vlgmr.msra.gmra.mxu0 %v34_v10 }
  0x7b   :  { %v116_v11 = vpop.permute.xlu0 %115 }
  0xc3   :  { %v108_v13 = vpop.f32.mrf.mxu0 }
  0xc4   :  { %v118_v14 = vmul.f32 %v116_v11, %v108_v13 }
  0xc6   :  { %v123_v15 = vmul.f32 %v188_v12, %v118_v14 }
  0xc8   :  { %124 = vst [vmem:[#allocation5] sm:$0xff] %v123_v15 }
  0xc9   :  { %135 = dma.vmem_to_hbm [thread:$0]  %s131_s27, 128, %s133_s30, [#allocation4]  }
  0xcb   :  { %v110_v16 = vpop.f32.mrf.mxu0 }
  0xcc   :  { %239 = dma.done.wait [#allocation4], 128  }
  0xcd   :  { %240 = vsyncadd [#allocation4], 4294967168 }
  0xce   :  { %140 = vsyncpa [#allocation3], 1 }
  0xcf   :  { %141 = vsyncpa [#allocation4], 1 }

</bundles_post_ra>
